<compile_context>
chip_gen: v5e
topology: v5e:2x2
jax: 0.10.0
libtpu: 0.0.40
codegen_flags: <defaults>
</compile_context>

<pallas_src>
import functools

import numpy as np
import jax
import jax.numpy as jnp
from jax.experimental import pallas as pl
from jax.experimental.pallas import tpu as pltpu


def _idct_kernel(x_ref, m_ref, o_ref):
    # Hot path: one lane-dense MXU matmul per grid step.
    o_ref[...] = jnp.dot(
        x_ref[...], m_ref[...], preferred_element_type=jnp.float32
    ).astype(o_ref.dtype)


def _round_up(a, b):
    return (a + b - 1) // b * b


@functools.lru_cache(maxsize=None)
def _packed_idct_matrix(n, pack, dtype_name):
    """Block-diagonal orthonormal inverse-DCT-II matrix, cached per (n, pack, dtype).

    y_frame = x_frame @ M with M[k, t] = c_k * cos(pi*k*(2t+1)/(2n)), identical
    to torch_dct.idct(x, norm='ortho') along the last axis.  Built in float64
    and cast once (so bf16 inputs only see a single deliberate cast of M).
    """
    k = np.arange(n)[:, None]
    t = np.arange(n)[None, :]
    m = np.cos(np.pi * k * (2 * t + 1) / (2.0 * n))
    scale = np.full((n, 1), np.sqrt(2.0 / n))
    scale[0, 0] = np.sqrt(1.0 / n)
    m = m * scale                                     # [n, n]
    p = n * pack
    mb = np.zeros((p, p), dtype=np.float64)
    for b in range(pack):
        mb[b * n:(b + 1) * n, b * n:(b + 1) * n] = m  # independent per-frame blocks
    return jnp.asarray(mb, dtype=jnp.dtype(dtype_name))


def idct_flatten(x, hop_length, *, tile_rows=512):
    """IDCT (norm='ortho') along last axis, then flatten last two dims.

    Matches `IDCT(hop_length).forward(x)` from the PyTorch module.
    """
    assert x.shape[-1] == hop_length
    lead = x.shape[:-2]
    frames = x.shape[-2]
    n = hop_length
    total_frames = int(np.prod(lead, dtype=np.int64)) * frames

    # Lane packing: pack consecutive frames so the last (lane) axis is 128-dense.
    if n < 128 and 128 % n == 0:
        pack = 128 // n
    else:
        # Lane-dense already (or awkward hop); fall back to one frame per row.
        # Note: for very large hop_length (>= ~2048) the resident (n, n) matrix
        # should be tiled over a K grid axis to respect v7x's 64 MiB VMEM.
        pack = 1
    p = n * pack

    # Pad the flat frame dimension so it packs and tiles evenly (kernel is
    # linear, so zero-padded rows are harmless and simply dropped afterwards).
    rows = _round_up(total_frames, pack) // pack          # packed rows of width p
    tile_rows_eff = min(tile_rows, _round_up(rows, 8))    # always a multiple of 8
    rows_pad = _round_up(rows, tile_rows_eff)
    frames_total_pad = rows_pad * pack

    xf = x.reshape(total_frames, n)
    if frames_total_pad != total_frames:
        xf = jnp.pad(xf, ((0, frames_total_pad - total_frames), (0, 0)))
    x2 = xf.reshape(rows_pad, p)

    m = _packed_idct_matrix(n, pack, jnp.dtype(x.dtype).name)

    itemsize = jnp.dtype(x.dtype).itemsize
    grid = (rows_pad // tile_rows_eff,)

    out2 = pl.pallas_call(
        _idct_kernel,
        out_shape=jax.ShapeDtypeStruct((rows_pad, p), x.dtype),
        grid_spec=pltpu.PrefetchScalarGridSpec(
            num_scalar_prefetch=0,
            grid=grid,
            in_specs=[
                pl.BlockSpec((tile_rows_eff, p), lambda i: (i, 0)),  # packed x tile
                pl.BlockSpec((p, p), lambda i: (0, 0)),              # IDCT matrix (resident)
            ],
            out_specs=pl.BlockSpec((tile_rows_eff, p), lambda i: (i, 0)),
        ),
        compiler_params=pltpu.CompilerParams(
            dimension_semantics=("parallel",),   # row axis shards across TCs (v7x megacore)
        ),
        cost_estimate=pl.CostEstimate(
            flops=2 * rows_pad * p * p,
            transcendentals=0,
            bytes_accessed=(2 * rows_pad * p + p * p) * itemsize,
        ),
    )(x2, m)

    # flatten(-2,-1): packed output is already in flattened frame order.
    out_flat = out2.reshape(-1)[: total_frames * n]
    return out_flat.reshape(*lead, frames * n)


if __name__ == "__main__":
    hop_length = 16
    key = jax.random.PRNGKey(0)
    # x: [batch=2, channels=4, frames=8, hop_length=16]
    x = jax.random.normal(key, (2, 4, 8, hop_length), dtype=jnp.float32)

    y = jax.block_until_ready(idct_flatten(x, hop_length))

    # Pure-JAX reference: explicit orthonormal IDCT matrix multiply + flatten.
    k = np.arange(hop_length)[:, None]
    t = np.arange(hop_length)[None, :]
    m_ref = np.cos(np.pi * k * (2 * t + 1) / (2.0 * hop_length))
    scale = np.full((hop_length, 1), np.sqrt(2.0 / hop_length))
    scale[0, 0] = np.sqrt(1.0 / hop_length)
    m_ref = jnp.asarray(m_ref * scale, dtype=jnp.float32)

    y_ref = (x.reshape(-1, hop_length) @ m_ref).reshape(2, 4, 8 * hop_length)
    assert y.shape == (2, 4, 8 * hop_length)
    assert jnp.allclose(y, y_ref, atol=1e-5, rtol=1e-5)

    # Ragged shape: exercises zero-padding of the packed rows (no asserts).
    x2 = jax.random.normal(jax.random.PRNGKey(1), (3, 5, 7, hop_length), jnp.float32)
    y2 = jax.block_until_ready(idct_flatten(x2, hop_length))
    y2_ref = (x2.reshape(-1, hop_length) @ m_ref).reshape(3, 5, 7 * hop_length)
    assert y2.shape == (3, 5, 7 * hop_length)
    assert jnp.allclose(y2, y2_ref, atol=1e-5, rtol=1e-5)

    print("KERNEL_OK")
</pallas_src>

<mosaic_0001>
module attributes {stable_mosaic.version = 11 : i64} {
  func.func @_idct_kernel(%arg0: i32, %arg1: memref<8x128xf32, #tpu.memory_space<vmem>>, %arg2: memref<128x128xf32, #tpu.memory_space<vmem>>, %arg3: memref<8x128xf32, #tpu.memory_space<vmem>>) attributes {dimension_semantics = [#tpu.dimension_semantics<parallel>], iteration_bounds = array<i64: 1>, scalar_prefetch = 0 : i64, scratch_operands = 0 : i64, tpu.core_type = #tpu.core_type<tc>, window_params = [{transform_indices = @transform_0, window_bounds = array<i64: 8, 128>}, {pipeline_mode = #tpu.pipeline_mode<synchronous>, transform_indices = @transform_1, window_bounds = array<i64: 128, 128>}, {transform_indices = @transform_2, window_bounds = array<i64: 8, 128>}]} {
    %c0 = arith.constant 0 : index
    %c0_0 = arith.constant 0 : index
    %0 = vector.load %arg1[%c0, %c0_0] : memref<8x128xf32, #tpu.memory_space<vmem>>, vector<8x128xf32>
    %c0_1 = arith.constant 0 : index
    %c0_2 = arith.constant 0 : index
    %1 = vector.load %arg2[%c0_1, %c0_2] : memref<128x128xf32, #tpu.memory_space<vmem>>, vector<128x128xf32>
    %cst = arith.constant dense<0.000000e+00> : vector<8x128xf32>
    %2 = tpu.matmul %0, %1, %cst {dimension_numbers = #tpu.dot_dimension_numbers<[1], [0], [0], [1], [0, 0, 1, 1], [], []>} : vector<8x128xf32>, vector<128x128xf32>, vector<8x128xf32> -> vector<8x128xf32>
    %c0_3 = arith.constant 0 : index
    %c0_4 = arith.constant 0 : index
    %3 = vector.load %arg3[%c0_3, %c0_4] : memref<8x128xf32, #tpu.memory_space<vmem>>, vector<8x128xf32>
    tpu.vector_store %arg3[%c0_3, %c0_4], %2 {strides = array<i32>} : memref<8x128xf32, #tpu.memory_space<vmem>>, vector<8x128xf32>,
    return
  }
  func.func @transform_0(%arg0: i32) -> (i32, i32) {
    %c0_i32 = arith.constant 0 : i32
    %c0_i32_0 = arith.constant 0 : i32
    return %arg0, %c0_i32 : i32, i32
  }
  func.func @transform_1(%arg0: i32) -> (i32, i32) {
    %c0_i32 = arith.constant 0 : i32
    %c0_i32_0 = arith.constant 0 : i32
    %c0_i32_1 = arith.constant 0 : i32
    return %c0_i32, %c0_i32_0 : i32, i32
  }
  func.func @transform_2(%arg0: i32) -> (i32, i32) {
    %c0_i32 = arith.constant 0 : i32
    %c0_i32_0 = arith.constant 0 : i32
    return %arg0, %c0_i32 : i32, i32
  }
}

</mosaic_0001>

<bundles_post_ra>
// kernel: tpu_custom_call.1
= control target key start
LH: loop header
LB: loop body
LE: loop exit
PB: predicated region body
PF: predicated region fallthrough
CT: control target
= control target key end

     0   :  { %7 = vsyncpa [#allocation3], 0  ;;  %s210_s0 = inlined_call_operand.hbm [shape: f32[8,128], index: 0, kind: input, shape index: {}]   ;;  %s211_s1 = inlined_call_operand.hbm [shape: f32[128,128], index: 1, kind: input, shape index: {}]   ;;  %s212_s2 = inlined_call_operand.hbm [shape: f32[8,128], index: 2, kind: output, shape index: {}]  }
   0x1   :  { %8 = vsyncpa [#allocation6], 0 }
   0x2   :  { %9 = vsyncpa [#allocation4], 0  ;;  %s15_s11 = sshll.u32 %s210_s0, 4  ;;  %s181_s12 = smov [#allocation2]   ;;  %s16_s11 = int_to_ptr.hbm [resolvable:$true] %s15_s11 }
   0x3   :  { %s17_s13 = sshll.u32 %s181_s12, 4  ;;  %s25_s16 = sshll.u32 %s211_s1, 4  ;;  %s18_s13 = int_to_ptr.vmem [resolvable:$true] %s17_s13  ;;  %s26_s16 = int_to_ptr.hbm [resolvable:$true] %s25_s16 }
   0x4   :  { %20 = dma.hbm_to_vmem [thread:$0]  %s16_s11, 128, %s18_s13, [#allocation3]  }
   0x5   :  { %s182_s17 = smov [#allocation5]   ;;  %s183_s19 = smov 128  }
   0x6   :  { %s27_s18 = sshll.u32 %s182_s17, 4  ;;  %s184_s20 = smov 8   ;;  %s28_s18 = int_to_ptr.vmem [resolvable:$true] %s27_s18 }
   0x7   :  { %33 = dma.hbm_to_vmem [thread:$0]  %s26_s16, 2048, %s28_s18, [#allocation6], %s183_s19, %s183_s19, %s184_s20  }
   0x8   :  { %175 = dma.done.wait [#allocation3], 128  }
   0x9   :  { %176 = vsyncadd [#allocation3], 4294967168 }
   0xa   :  { %177 = dma.done.wait [#allocation6], 2048  }
   0xb   :  { %178 = vsyncadd [#allocation6], 4294965248  ;;  %v58_v0 = vld [vmem:[#allocation5 + $0x78] sm:$0xff]  ;;  %v57_v1 = vld [vmem:[#allocation5 + $0x70] sm:$0xff]  ;;  %s185_s0 = smov [#allocation7]   ;;  %s87_s23 = sshll.u32 %s212_s2, 4  ;;  %s88_s23 = int_to_ptr.hbm [resolvable:$true] %s87_s23 }
   0xc   :  { %59 = vmatpush.msra.mxu0 %v58_v0  ;;  %v56_v2 = vld [vmem:[#allocation5 + $0x68] sm:$0xff]  ;;  %v55_v3 = vld [vmem:[#allocation5 + $0x60] sm:$0xff]  ;;  %v54_v4 = vld [vmem:[#allocation5 + $0x58] sm:$0xff]  ;;  %s85_s1 = sshll.u32 %s185_s0, 4  ;;  %s86_s1 = int_to_ptr.vmem [resolvable:$true] %s85_s1 }
   0xd   :  { %v53_v5 = vld [vmem:[#allocation5 + $0x50] sm:$0xff]  ;;  %v52_v6 = vld [vmem:[#allocation5 + $0x48] sm:$0xff]  ;;  %v51_v7 = vld [vmem:[#allocation5 + $0x40] sm:$0xff] }
   0xe   :  { %60 = vmatpush.msra.mxu0 %v57_v1  ;;  %v50_v8 = vld [vmem:[#allocation5 + $0x38] sm:$0xff]  ;;  %v49_v9 = vld [vmem:[#allocation5 + $0x30] sm:$0xff]  ;;  %v48_v10 = vld [vmem:[#allocation5 + $0x28] sm:$0xff] }
   0xf   :  { %v47_v11 = vld [vmem:[#allocation5 + $0x20] sm:$0xff]  ;;  %v46_v12 = vld [vmem:[#allocation5 + $0x18] sm:$0xff]  ;;  %v45_v13 = vld [vmem:[#allocation5 + $0x10] sm:$0xff] }
  0x10   :  { %61 = vmatpush.msra.mxu0 %v56_v2  ;;  %v44_v14 = vld [vmem:[#allocation5 + $0x8] sm:$0xff]  ;;  %v43_v15 = vld [vmem:[#allocation5] sm:$0xff]  ;;  %v42_v16 = vld [vmem:[#allocation2] sm:$0xff] }
  0x12   :  { %62 = vmatpush.msra.mxu0 %v55_v3 }
  0x14   :  { %63 = vmatpush.msra.mxu0 %v54_v4 }
  0x16   :  { %64 = vmatpush.msra.mxu0 %v53_v5 }
  0x18   :  { %65 = vmatpush.msra.mxu0 %v52_v6 }
  0x1a   :  { %66 = vmatpush.msra.mxu0 %v51_v7 }
  0x1c   :  { %67 = vmatpush.msra.mxu0 %v50_v8 }
  0x1e   :  { %68 = vmatpush.msra.mxu0 %v49_v9 }
  0x20   :  { %69 = vmatpush.msra.mxu0 %v48_v10 }
  0x22   :  { %70 = vmatpush.msra.mxu0 %v47_v11 }
  0x24   :  { %71 = vmatpush.msra.mxu0 %v46_v12 }
  0x26   :  { %72 = vmatpush.msra.mxu0 %v45_v13 }
  0x28   :  { %73 = vmatpush.msra.mxu0 %v44_v14 }
  0x2a   :  { %74 = vmatpush.msra.mxu0 %v43_v15 }
  0x2b   :  { %75 = vmatmul.f32.vlgmr.msra.gmra.mxu0 %v42_v16 }
  0xa8   :  { %v76_v17 = vpop.f32.mrf.mxu0 }
  0xa9   :  { %79 = vst [vmem:[#allocation7] sm:$0xff] %v76_v17 }
  0xaa   :  { %90 = dma.vmem_to_hbm [thread:$0]  %s86_s1, 128, %s88_s23, [#allocation4]  }
  0xab   :  { %179 = dma.done.wait [#allocation4], 128  }
  0xac   :  { %180 = vsyncadd [#allocation4], 4294967168 }
  0xad   :  { %95 = vsyncpa [#allocation3], 1 }
  0xae   :  { %96 = vsyncpa [#allocation6], 1 }
  0xaf   :  { %97 = vsyncpa [#allocation4], 1 }

</bundles_post_ra>
